<compile_context>
chip_gen: v5e
topology: v5e:2x2
jax: 0.10.0
libtpu: 0.0.40
codegen_flags: <defaults>
</compile_context>

<pallas_src>
import jax
import jax.numpy as jnp
from jax import lax
from jax.experimental import pallas as pl
from jax.experimental.pallas import tpu as pltpu


def _round_up(x, m):
    return (x + m - 1) // m * m


def _make_fused_kernel(dims, tile_b):
    """Build the fused gather kernel for fields with embedding dims `dims`."""
    num_fields = len(dims)
    offsets = []
    acc = 0
    for d in dims:
        offsets.append(acc)
        acc += d
    # Small tiles: fully unroll the row loop for LLO scheduling visibility.
    unroll = True if tile_b <= 16 else 8

    def kernel(idx_ref, *refs):
        # refs = (table_ref_0, ..., table_ref_{F-1}, out_ref)
        table_refs = refs[:num_fields]
        out_ref = refs[num_fields]
        base = pl.program_id(0) * tile_b

        def row_body(r, carry):
            row = base + r
            # Static loop over fields; each copies one table row into its
            # static column slice of the fused output block (all in VMEM).
            for f in range(num_fields):
                d = dims[f]
                off = offsets[f]
                idx = idx_ref[row * num_fields + f]          # SMEM scalar read
                out_ref[pl.ds(r, 1), off:off + d] = table_refs[f][pl.ds(idx, 1), :]
            return carry

        lax.fori_loop(0, tile_b, row_body, 0, unroll=unroll)

    return kernel


def feature_extractor_forward(category_inputs, tables):
    """Fused embedding gather + concat.

    category_inputs: [B, F] integer ids; tables[i]: [vocab_i, dim_i] float32.
    Returns [B, sum(dim_i)] float32 (== torch.cat of per-field lookups).
    """
    B, F = category_inputs.shape
    assert F == len(tables)
    dims = [int(t.shape[1]) for t in tables]
    total_d = sum(dims)
    dtype = tables[0].dtype

    # Batch tile: multiple of 8 sublanes, capped at 128 rows per grid step.
    tile_b = min(128, _round_up(B, 8))
    b_pad = _round_up(B, tile_b)

    idx = category_inputs.astype(jnp.int32)
    if b_pad != B:
        idx = jnp.pad(idx, ((0, b_pad - B), (0, 0)))   # pad rows gather row 0 (valid)
    idx_flat = idx.reshape(-1)                         # 1-D SMEM prefetch (minimal padding)

    kernel = _make_fused_kernel(dims, tile_b)

    out = pl.pallas_call(
        kernel,
        out_shape=jax.ShapeDtypeStruct((b_pad, total_d), dtype),
        grid_spec=pltpu.PrefetchScalarGridSpec(
            num_scalar_prefetch=1,                     # flattened [B*F] ids -> SMEM
            grid=(b_pad // tile_b,),
            in_specs=[
                # Full table resident in VMEM; constant block index => DMA'd once.
                pl.BlockSpec((int(t.shape[0]), int(t.shape[1])),
                             lambda i, idx_ref: (0, 0))
                for t in tables
            ],
            # Lane-dense fused output slab per batch tile.
            out_specs=pl.BlockSpec((tile_b, total_d), lambda i, idx_ref: (i, 0)),
        ),
        compiler_params=pltpu.CompilerParams(
            dimension_semantics=("parallel",)),        # shard batch tiles across TCs
    )(idx_flat, *tables)

    return out[:B] if b_pad != B else out


class FeatureExtractorPallas:
    """Pallas equivalent of the PyTorch FeatureExtractor module."""

    def __init__(self, embedding_sizes, key):
        # nn.Embedding default init is N(0, 1); reproduce deterministically.
        self.tables = []
        for (unique_size, embedding_dim) in embedding_sizes:
            key, sub = jax.random.split(key)
            self.tables.append(
                jax.random.normal(sub, (unique_size, embedding_dim), jnp.float32))

    def __call__(self, category_inputs):
        return feature_extractor_forward(category_inputs, self.tables)


def _reference(category_inputs, tables):
    h = [jnp.take(t, category_inputs[:, i], axis=0) for i, t in enumerate(tables)]
    return jnp.concatenate(h, axis=1)


if __name__ == "__main__":
    key = jax.random.PRNGKey(0)

    # (unique_size, embedding_dim) per categorical field — small synthetic sizes.
    embedding_sizes = [(10, 16), (20, 32), (7, 16)]
    batch = 8

    key, k_model, k_idx = jax.random.split(key, 3)
    model = FeatureExtractorPallas(embedding_sizes, k_model)

    # category_inputs[:, i] must be < unique_size of field i
    cols = []
    for i, (vocab, _) in enumerate(embedding_sizes):
        k_idx, sub = jax.random.split(k_idx)
        cols.append(jax.random.randint(sub, (batch, 1), 0, vocab, dtype=jnp.int32))
    category_inputs = jnp.concatenate(cols, axis=1)   # [B, F]

    out = model(category_inputs)
    out = jax.block_until_ready(out)

    ref = _reference(category_inputs, model.tables)
    assert out.shape == (batch, sum(d for _, d in embedding_sizes)), out.shape
    assert jnp.allclose(out, ref), "Pallas fused embedding gather mismatch vs reference"

    print("KERNEL_OK")
</pallas_src>

<mosaic_0001>
module attributes {stable_mosaic.version = 11 : i64} {
  func.func @kernel(%arg0: i32, %arg1: memref<24xi32, #tpu.memory_space<smem>>, %arg2: memref<10x16xf32, #tpu.memory_space<vmem>>, %arg3: memref<20x32xf32, #tpu.memory_space<vmem>>, %arg4: memref<7x16xf32, #tpu.memory_space<vmem>>, %arg5: memref<8x64xf32, #tpu.memory_space<vmem>>) attributes {dimension_semantics = [#tpu.dimension_semantics<parallel>], iteration_bounds = array<i64: 1>, scalar_prefetch = 1 : i64, scratch_operands = 0 : i64, tpu.core_type = #tpu.core_type<tc>, window_params = [{pipeline_mode = #tpu.pipeline_mode<synchronous>, transform_indices = @transform_0, window_bounds = array<i64: 10, 16>}, {pipeline_mode = #tpu.pipeline_mode<synchronous>, transform_indices = @transform_1, window_bounds = array<i64: 20, 32>}, {pipeline_mode = #tpu.pipeline_mode<synchronous>, transform_indices = @transform_2, window_bounds = array<i64: 7, 16>}, {transform_indices = @transform_3, window_bounds = array<i64: 8, 64>}]} {
    %c8_i32 = arith.constant 8 : i32
    %0 = arith.muli %arg0, %c8_i32 : i32
    %c0_i32 = arith.constant 0 : i32
    %1 = arith.addi %0, %c0_i32 : i32
    %c3_i32 = arith.constant 3 : i32
    %2 = arith.muli %1, %c3_i32 : i32
    %c0_i32_0 = arith.constant 0 : i32
    %3 = arith.addi %2, %c0_i32_0 : i32
    %4 = arith.index_cast %3 : i32 to index
    %5 = memref.load %arg1[%4] : memref<24xi32, #tpu.memory_space<smem>>
    %6 = arith.index_cast %5 : i32 to index
    %c0 = arith.constant 0 : index
    %7 = vector.load %arg2[%6, %c0] : memref<10x16xf32, #tpu.memory_space<vmem>>, vector<1x16xf32>
    %8 = arith.index_cast %c0_i32 : i32 to index
    %c0_1 = arith.constant 0 : index
    %9 = vector.load %arg5[%8, %c0_1] : memref<8x64xf32, #tpu.memory_space<vmem>>, vector<1x16xf32>
    tpu.vector_store %arg5[%8, %c0_1], %7 {strides = array<i32>} : memref<8x64xf32, #tpu.memory_space<vmem>>, vector<1x16xf32>,
    %c3_i32_2 = arith.constant 3 : i32
    %10 = arith.muli %1, %c3_i32_2 : i32
    %c1_i32 = arith.constant 1 : i32
    %11 = arith.addi %10, %c1_i32 : i32
    %12 = arith.index_cast %11 : i32 to index
    %13 = memref.load %arg1[%12] : memref<24xi32, #tpu.memory_space<smem>>
    %14 = arith.index_cast %13 : i32 to index
    %c0_3 = arith.constant 0 : index
    %15 = vector.load %arg3[%14, %c0_3] : memref<20x32xf32, #tpu.memory_space<vmem>>, vector<1x32xf32>
    %16 = arith.index_cast %c0_i32 : i32 to index
    %c16 = arith.constant 16 : index
    %17 = vector.load %arg5[%16, %c16] : memref<8x64xf32, #tpu.memory_space<vmem>>, vector<1x32xf32>
    tpu.vector_store %arg5[%16, %c16], %15 {strides = array<i32>} : memref<8x64xf32, #tpu.memory_space<vmem>>, vector<1x32xf32>,
    %c3_i32_4 = arith.constant 3 : i32
    %18 = arith.muli %1, %c3_i32_4 : i32
    %c2_i32 = arith.constant 2 : i32
    %19 = arith.addi %18, %c2_i32 : i32
    %20 = arith.index_cast %19 : i32 to index
    %21 = memref.load %arg1[%20] : memref<24xi32, #tpu.memory_space<smem>>
    %22 = arith.index_cast %21 : i32 to index
    %c0_5 = arith.constant 0 : index
    %23 = vector.load %arg4[%22, %c0_5] : memref<7x16xf32, #tpu.memory_space<vmem>>, vector<1x16xf32>
    %24 = arith.index_cast %c0_i32 : i32 to index
    %c48 = arith.constant 48 : index
    %25 = vector.load %arg5[%24, %c48] : memref<8x64xf32, #tpu.memory_space<vmem>>, vector<1x16xf32>
    tpu.vector_store %arg5[%24, %c48], %23 {strides = array<i32>} : memref<8x64xf32, #tpu.memory_space<vmem>>, vector<1x16xf32>,
    %c1_i32_6 = arith.constant 1 : i32
    %26 = arith.addi %0, %c1_i32_6 : i32
    %c3_i32_7 = arith.constant 3 : i32
    %27 = arith.muli %26, %c3_i32_7 : i32
    %c0_i32_8 = arith.constant 0 : i32
    %28 = arith.addi %27, %c0_i32_8 : i32
    %29 = arith.index_cast %28 : i32 to index
    %30 = memref.load %arg1[%29] : memref<24xi32, #tpu.memory_space<smem>>
    %31 = arith.index_cast %30 : i32 to index
    %c0_9 = arith.constant 0 : index
    %32 = vector.load %arg2[%31, %c0_9] : memref<10x16xf32, #tpu.memory_space<vmem>>, vector<1x16xf32>
    %33 = arith.index_cast %c1_i32_6 : i32 to index
    %c0_10 = arith.constant 0 : index
    %34 = vector.load %arg5[%33, %c0_10] : memref<8x64xf32, #tpu.memory_space<vmem>>, vector<1x16xf32>
    tpu.vector_store %arg5[%33, %c0_10], %32 {strides = array<i32>} : memref<8x64xf32, #tpu.memory_space<vmem>>, vector<1x16xf32>,
    %c3_i32_11 = arith.constant 3 : i32
    %35 = arith.muli %26, %c3_i32_11 : i32
    %c1_i32_12 = arith.constant 1 : i32
    %36 = arith.addi %35, %c1_i32_12 : i32
    %37 = arith.index_cast %36 : i32 to index
    %38 = memref.load %arg1[%37] : memref<24xi32, #tpu.memory_space<smem>>
    %39 = arith.index_cast %38 : i32 to index
    %c0_13 = arith.constant 0 : index
    %40 = vector.load %arg3[%39, %c0_13] : memref<20x32xf32, #tpu.memory_space<vmem>>, vector<1x32xf32>
    %41 = arith.index_cast %c1_i32_6 : i32 to index
    %c16_14 = arith.constant 16 : index
    %42 = vector.load %arg5[%41, %c16_14] : memref<8x64xf32, #tpu.memory_space<vmem>>, vector<1x32xf32>
    tpu.vector_store %arg5[%41, %c16_14], %40 {strides = array<i32>} : memref<8x64xf32, #tpu.memory_space<vmem>>, vector<1x32xf32>,
    %c3_i32_15 = arith.constant 3 : i32
    %43 = arith.muli %26, %c3_i32_15 : i32
    %c2_i32_16 = arith.constant 2 : i32
    %44 = arith.addi %43, %c2_i32_16 : i32
    %45 = arith.index_cast %44 : i32 to index
    %46 = memref.load %arg1[%45] : memref<24xi32, #tpu.memory_space<smem>>
    %47 = arith.index_cast %46 : i32 to index
    %c0_17 = arith.constant 0 : index
    %48 = vector.load %arg4[%47, %c0_17] : memref<7x16xf32, #tpu.memory_space<vmem>>, vector<1x16xf32>
    %49 = arith.index_cast %c1_i32_6 : i32 to index
    %c48_18 = arith.constant 48 : index
    %50 = vector.load %arg5[%49, %c48_18] : memref<8x64xf32, #tpu.memory_space<vmem>>, vector<1x16xf32>
    tpu.vector_store %arg5[%49, %c48_18], %48 {strides = array<i32>} : memref<8x64xf32, #tpu.memory_space<vmem>>, vector<1x16xf32>,
    %c2_i32_19 = arith.constant 2 : i32
    %51 = arith.addi %0, %c2_i32_19 : i32
    %c3_i32_20 = arith.constant 3 : i32
    %52 = arith.muli %51, %c3_i32_20 : i32
    %c0_i32_21 = arith.constant 0 : i32
    %53 = arith.addi %52, %c0_i32_21 : i32
    %54 = arith.index_cast %53 : i32 to index
    %55 = memref.load %arg1[%54] : memref<24xi32, #tpu.memory_space<smem>>
    %56 = arith.index_cast %55 : i32 to index
    %c0_22 = arith.constant 0 : index
    %57 = vector.load %arg2[%56, %c0_22] : memref<10x16xf32, #tpu.memory_space<vmem>>, vector<1x16xf32>
    %58 = arith.index_cast %c2_i32_19 : i32 to index
    %c0_23 = arith.constant 0 : index
    %59 = vector.load %arg5[%58, %c0_23] : memref<8x64xf32, #tpu.memory_space<vmem>>, vector<1x16xf32>
    tpu.vector_store %arg5[%58, %c0_23], %57 {strides = array<i32>} : memref<8x64xf32, #tpu.memory_space<vmem>>, vector<1x16xf32>,
    %c3_i32_24 = arith.constant 3 : i32
    %60 = arith.muli %51, %c3_i32_24 : i32
    %c1_i32_25 = arith.constant 1 : i32
    %61 = arith.addi %60, %c1_i32_25 : i32
    %62 = arith.index_cast %61 : i32 to index
    %63 = memref.load %arg1[%62] : memref<24xi32, #tpu.memory_space<smem>>
    %64 = arith.index_cast %63 : i32 to index
    %c0_26 = arith.constant 0 : index
    %65 = vector.load %arg3[%64, %c0_26] : memref<20x32xf32, #tpu.memory_space<vmem>>, vector<1x32xf32>
    %66 = arith.index_cast %c2_i32_19 : i32 to index
    %c16_27 = arith.constant 16 : index
    %67 = vector.load %arg5[%66, %c16_27] : memref<8x64xf32, #tpu.memory_space<vmem>>, vector<1x32xf32>
    tpu.vector_store %arg5[%66, %c16_27], %65 {strides = array<i32>} : memref<8x64xf32, #tpu.memory_space<vmem>>, vector<1x32xf32>,
    %c3_i32_28 = arith.constant 3 : i32
    %68 = arith.muli %51, %c3_i32_28 : i32
    %c2_i32_29 = arith.constant 2 : i32
    %69 = arith.addi %68, %c2_i32_29 : i32
    %70 = arith.index_cast %69 : i32 to index
    %71 = memref.load %arg1[%70] : memref<24xi32, #tpu.memory_space<smem>>
    %72 = arith.index_cast %71 : i32 to index
    %c0_30 = arith.constant 0 : index
    %73 = vector.load %arg4[%72, %c0_30] : memref<7x16xf32, #tpu.memory_space<vmem>>, vector<1x16xf32>
    %74 = arith.index_cast %c2_i32_19 : i32 to index
    %c48_31 = arith.constant 48 : index
    %75 = vector.load %arg5[%74, %c48_31] : memref<8x64xf32, #tpu.memory_space<vmem>>, vector<1x16xf32>
    tpu.vector_store %arg5[%74, %c48_31], %73 {strides = array<i32>} : memref<8x64xf32, #tpu.memory_space<vmem>>, vector<1x16xf32>,
    %c3_i32_32 = arith.constant 3 : i32
    %76 = arith.addi %0, %c3_i32_32 : i32
    %c3_i32_33 = arith.constant 3 : i32
    %77 = arith.muli %76, %c3_i32_33 : i32
    %c0_i32_34 = arith.constant 0 : i32
    %78 = arith.addi %77, %c0_i32_34 : i32
    %79 = arith.index_cast %78 : i32 to index
    %80 = memref.load %arg1[%79] : memref<24xi32, #tpu.memory_space<smem>>
    %81 = arith.index_cast %80 : i32 to index
    %c0_35 = arith.constant 0 : index
    %82 = vector.load %arg2[%81, %c0_35] : memref<10x16xf32, #tpu.memory_space<vmem>>, vector<1x16xf32>
    %83 = arith.index_cast %c3_i32_32 : i32 to index
    %c0_36 = arith.constant 0 : index
    %84 = vector.load %arg5[%83, %c0_36] : memref<8x64xf32, #tpu.memory_space<vmem>>, vector<1x16xf32>
    tpu.vector_store %arg5[%83, %c0_36], %82 {strides = array<i32>} : memref<8x64xf32, #tpu.memory_space<vmem>>, vector<1x16xf32>,
    %c3_i32_37 = arith.constant 3 : i32
    %85 = arith.muli %76, %c3_i32_37 : i32
    %c1_i32_38 = arith.constant 1 : i32
    %86 = arith.addi %85, %c1_i32_38 : i32
    %87 = arith.index_cast %86 : i32 to index
    %88 = memref.load %arg1[%87] : memref<24xi32, #tpu.memory_space<smem>>
    %89 = arith.index_cast %88 : i32 to index
    %c0_39 = arith.constant 0 : index
    %90 = vector.load %arg3[%89, %c0_39] : memref<20x32xf32, #tpu.memory_space<vmem>>, vector<1x32xf32>
    %91 = arith.index_cast %c3_i32_32 : i32 to index
    %c16_40 = arith.constant 16 : index
    %92 = vector.load %arg5[%91, %c16_40] : memref<8x64xf32, #tpu.memory_space<vmem>>, vector<1x32xf32>
    tpu.vector_store %arg5[%91, %c16_40], %90 {strides = array<i32>} : memref<8x64xf32, #tpu.memory_space<vmem>>, vector<1x32xf32>,
    %c3_i32_41 = arith.constant 3 : i32
    %93 = arith.muli %76, %c3_i32_41 : i32
    %c2_i32_42 = arith.constant 2 : i32
    %94 = arith.addi %93, %c2_i32_42 : i32
    %95 = arith.index_cast %94 : i32 to index
    %96 = memref.load %arg1[%95] : memref<24xi32, #tpu.memory_space<smem>>
    %97 = arith.index_cast %96 : i32 to index
    %c0_43 = arith.constant 0 : index
    %98 = vector.load %arg4[%97, %c0_43] : memref<7x16xf32, #tpu.memory_space<vmem>>, vector<1x16xf32>
    %99 = arith.index_cast %c3_i32_32 : i32 to index
    %c48_44 = arith.constant 48 : index
    %100 = vector.load %arg5[%99, %c48_44] : memref<8x64xf32, #tpu.memory_space<vmem>>, vector<1x16xf32>
    tpu.vector_store %arg5[%99, %c48_44], %98 {strides = array<i32>} : memref<8x64xf32, #tpu.memory_space<vmem>>, vector<1x16xf32>,
    %c4_i32 = arith.constant 4 : i32
    %101 = arith.addi %0, %c4_i32 : i32
    %c3_i32_45 = arith.constant 3 : i32
    %102 = arith.muli %101, %c3_i32_45 : i32
    %c0_i32_46 = arith.constant 0 : i32
    %103 = arith.addi %102, %c0_i32_46 : i32
    %104 = arith.index_cast %103 : i32 to index
    %105 = memref.load %arg1[%104] : memref<24xi32, #tpu.memory_space<smem>>
    %106 = arith.index_cast %105 : i32 to index
    %c0_47 = arith.constant 0 : index
    %107 = vector.load %arg2[%106, %c0_47] : memref<10x16xf32, #tpu.memory_space<vmem>>, vector<1x16xf32>
    %108 = arith.index_cast %c4_i32 : i32 to index
    %c0_48 = arith.constant 0 : index
    %109 = vector.load %arg5[%108, %c0_48] : memref<8x64xf32, #tpu.memory_space<vmem>>, vector<1x16xf32>
    tpu.vector_store %arg5[%108, %c0_48], %107 {strides = array<i32>} : memref<8x64xf32, #tpu.memory_space<vmem>>, vector<1x16xf32>,
    %c3_i32_49 = arith.constant 3 : i32
    %110 = arith.muli %101, %c3_i32_49 : i32
    %c1_i32_50 = arith.constant 1 : i32
    %111 = arith.addi %110, %c1_i32_50 : i32
    %112 = arith.index_cast %111 : i32 to index
    %113 = memref.load %arg1[%112] : memref<24xi32, #tpu.memory_space<smem>>
    %114 = arith.index_cast %113 : i32 to index
    %c0_51 = arith.constant 0 : index
    %115 = vector.load %arg3[%114, %c0_51] : memref<20x32xf32, #tpu.memory_space<vmem>>, vector<1x32xf32>
    %116 = arith.index_cast %c4_i32 : i32 to index
    %c16_52 = arith.constant 16 : index
    %117 = vector.load %arg5[%116, %c16_52] : memref<8x64xf32, #tpu.memory_space<vmem>>, vector<1x32xf32>
    tpu.vector_store %arg5[%116, %c16_52], %115 {strides = array<i32>} : memref<8x64xf32, #tpu.memory_space<vmem>>, vector<1x32xf32>,
    %c3_i32_53 = arith.constant 3 : i32
    %118 = arith.muli %101, %c3_i32_53 : i32
    %c2_i32_54 = arith.constant 2 : i32
    %119 = arith.addi %118, %c2_i32_54 : i32
    %120 = arith.index_cast %119 : i32 to index
    %121 = memref.load %arg1[%120] : memref<24xi32, #tpu.memory_space<smem>>
    %122 = arith.index_cast %121 : i32 to index
    %c0_55 = arith.constant 0 : index
    %123 = vector.load %arg4[%122, %c0_55] : memref<7x16xf32, #tpu.memory_space<vmem>>, vector<1x16xf32>
    %124 = arith.index_cast %c4_i32 : i32 to index
    %c48_56 = arith.constant 48 : index
    %125 = vector.load %arg5[%124, %c48_56] : memref<8x64xf32, #tpu.memory_space<vmem>>, vector<1x16xf32>
    tpu.vector_store %arg5[%124, %c48_56], %123 {strides = array<i32>} : memref<8x64xf32, #tpu.memory_space<vmem>>, vector<1x16xf32>,
    %c5_i32 = arith.constant 5 : i32
    %126 = arith.addi %0, %c5_i32 : i32
    %c3_i32_57 = arith.constant 3 : i32
    %127 = arith.muli %126, %c3_i32_57 : i32
    %c0_i32_58 = arith.constant 0 : i32
    %128 = arith.addi %127, %c0_i32_58 : i32
    %129 = arith.index_cast %128 : i32 to index
    %130 = memref.load %arg1[%129] : memref<24xi32, #tpu.memory_space<smem>>
    %131 = arith.index_cast %130 : i32 to index
    %c0_59 = arith.constant 0 : index
    %132 = vector.load %arg2[%131, %c0_59] : memref<10x16xf32, #tpu.memory_space<vmem>>, vector<1x16xf32>
    %133 = arith.index_cast %c5_i32 : i32 to index
    %c0_60 = arith.constant 0 : index
    %134 = vector.load %arg5[%133, %c0_60] : memref<8x64xf32, #tpu.memory_space<vmem>>, vector<1x16xf32>
    tpu.vector_store %arg5[%133, %c0_60], %132 {strides = array<i32>} : memref<8x64xf32, #tpu.memory_space<vmem>>, vector<1x16xf32>,
    %c3_i32_61 = arith.constant 3 : i32
    %135 = arith.muli %126, %c3_i32_61 : i32
    %c1_i32_62 = arith.constant 1 : i32
    %136 = arith.addi %135, %c1_i32_62 : i32
    %137 = arith.index_cast %136 : i32 to index
    %138 = memref.load %arg1[%137] : memref<24xi32, #tpu.memory_space<smem>>
    %139 = arith.index_cast %138 : i32 to index
    %c0_63 = arith.constant 0 : index
    %140 = vector.load %arg3[%139, %c0_63] : memref<20x32xf32, #tpu.memory_space<vmem>>, vector<1x32xf32>
    %141 = arith.index_cast %c5_i32 : i32 to index
    %c16_64 = arith.constant 16 : index
    %142 = vector.load %arg5[%141, %c16_64] : memref<8x64xf32, #tpu.memory_space<vmem>>, vector<1x32xf32>
    tpu.vector_store %arg5[%141, %c16_64], %140 {strides = array<i32>} : memref<8x64xf32, #tpu.memory_space<vmem>>, vector<1x32xf32>,
    %c3_i32_65 = arith.constant 3 : i32
    %143 = arith.muli %126, %c3_i32_65 : i32
    %c2_i32_66 = arith.constant 2 : i32
    %144 = arith.addi %143, %c2_i32_66 : i32
    %145 = arith.index_cast %144 : i32 to index
    %146 = memref.load %arg1[%145] : memref<24xi32, #tpu.memory_space<smem>>
    %147 = arith.index_cast %146 : i32 to index
    %c0_67 = arith.constant 0 : index
    %148 = vector.load %arg4[%147, %c0_67] : memref<7x16xf32, #tpu.memory_space<vmem>>, vector<1x16xf32>
    %149 = arith.index_cast %c5_i32 : i32 to index
    %c48_68 = arith.constant 48 : index
    %150 = vector.load %arg5[%149, %c48_68] : memref<8x64xf32, #tpu.memory_space<vmem>>, vector<1x16xf32>
    tpu.vector_store %arg5[%149, %c48_68], %148 {strides = array<i32>} : memref<8x64xf32, #tpu.memory_space<vmem>>, vector<1x16xf32>,
    %c6_i32 = arith.constant 6 : i32
    %151 = arith.addi %0, %c6_i32 : i32
    %c3_i32_69 = arith.constant 3 : i32
    %152 = arith.muli %151, %c3_i32_69 : i32
    %c0_i32_70 = arith.constant 0 : i32
    %153 = arith.addi %152, %c0_i32_70 : i32
    %154 = arith.index_cast %153 : i32 to index
    %155 = memref.load %arg1[%154] : memref<24xi32, #tpu.memory_space<smem>>
    %156 = arith.index_cast %155 : i32 to index
    %c0_71 = arith.constant 0 : index
    %157 = vector.load %arg2[%156, %c0_71] : memref<10x16xf32, #tpu.memory_space<vmem>>, vector<1x16xf32>
    %158 = arith.index_cast %c6_i32 : i32 to index
    %c0_72 = arith.constant 0 : index
    %159 = vector.load %arg5[%158, %c0_72] : memref<8x64xf32, #tpu.memory_space<vmem>>, vector<1x16xf32>
    tpu.vector_store %arg5[%158, %c0_72], %157 {strides = array<i32>} : memref<8x64xf32, #tpu.memory_space<vmem>>, vector<1x16xf32>,
    %c3_i32_73 = arith.constant 3 : i32
    %160 = arith.muli %151, %c3_i32_73 : i32
    %c1_i32_74 = arith.constant 1 : i32
    %161 = arith.addi %160, %c1_i32_74 : i32
    %162 = arith.index_cast %161 : i32 to index
    %163 = memref.load %arg1[%162] : memref<24xi32, #tpu.memory_space<smem>>
    %164 = arith.index_cast %163 : i32 to index
    %c0_75 = arith.constant 0 : index
    %165 = vector.load %arg3[%164, %c0_75] : memref<20x32xf32, #tpu.memory_space<vmem>>, vector<1x32xf32>
    %166 = arith.index_cast %c6_i32 : i32 to index
    %c16_76 = arith.constant 16 : index
    %167 = vector.load %arg5[%166, %c16_76] : memref<8x64xf32, #tpu.memory_space<vmem>>, vector<1x32xf32>
    tpu.vector_store %arg5[%166, %c16_76], %165 {strides = array<i32>} : memref<8x64xf32, #tpu.memory_space<vmem>>, vector<1x32xf32>,
    %c3_i32_77 = arith.constant 3 : i32
    %168 = arith.muli %151, %c3_i32_77 : i32
    %c2_i32_78 = arith.constant 2 : i32
    %169 = arith.addi %168, %c2_i32_78 : i32
    %170 = arith.index_cast %169 : i32 to index
    %171 = memref.load %arg1[%170] : memref<24xi32, #tpu.memory_space<smem>>
    %172 = arith.index_cast %171 : i32 to index
    %c0_79 = arith.constant 0 : index
    %173 = vector.load %arg4[%172, %c0_79] : memref<7x16xf32, #tpu.memory_space<vmem>>, vector<1x16xf32>
    %174 = arith.index_cast %c6_i32 : i32 to index
    %c48_80 = arith.constant 48 : index
    %175 = vector.load %arg5[%174, %c48_80] : memref<8x64xf32, #tpu.memory_space<vmem>>, vector<1x16xf32>
    tpu.vector_store %arg5[%174, %c48_80], %173 {strides = array<i32>} : memref<8x64xf32, #tpu.memory_space<vmem>>, vector<1x16xf32>,
    %c7_i32 = arith.constant 7 : i32
    %176 = arith.addi %0, %c7_i32 : i32
    %c3_i32_81 = arith.constant 3 : i32
    %177 = arith.muli %176, %c3_i32_81 : i32
    %c0_i32_82 = arith.constant 0 : i32
    %178 = arith.addi %177, %c0_i32_82 : i32
    %179 = arith.index_cast %178 : i32 to index
    %180 = memref.load %arg1[%179] : memref<24xi32, #tpu.memory_space<smem>>
    %181 = arith.index_cast %180 : i32 to index
    %c0_83 = arith.constant 0 : index
    %182 = vector.load %arg2[%181, %c0_83] : memref<10x16xf32, #tpu.memory_space<vmem>>, vector<1x16xf32>
    %183 = arith.index_cast %c7_i32 : i32 to index
    %c0_84 = arith.constant 0 : index
    %184 = vector.load %arg5[%183, %c0_84] : memref<8x64xf32, #tpu.memory_space<vmem>>, vector<1x16xf32>
    tpu.vector_store %arg5[%183, %c0_84], %182 {strides = array<i32>} : memref<8x64xf32, #tpu.memory_space<vmem>>, vector<1x16xf32>,
    %c3_i32_85 = arith.constant 3 : i32
    %185 = arith.muli %176, %c3_i32_85 : i32
    %c1_i32_86 = arith.constant 1 : i32
    %186 = arith.addi %185, %c1_i32_86 : i32
    %187 = arith.index_cast %186 : i32 to index
    %188 = memref.load %arg1[%187] : memref<24xi32, #tpu.memory_space<smem>>
    %189 = arith.index_cast %188 : i32 to index
    %c0_87 = arith.constant 0 : index
    %190 = vector.load %arg3[%189, %c0_87] : memref<20x32xf32, #tpu.memory_space<vmem>>, vector<1x32xf32>
    %191 = arith.index_cast %c7_i32 : i32 to index
    %c16_88 = arith.constant 16 : index
    %192 = vector.load %arg5[%191, %c16_88] : memref<8x64xf32, #tpu.memory_space<vmem>>, vector<1x32xf32>
    tpu.vector_store %arg5[%191, %c16_88], %190 {strides = array<i32>} : memref<8x64xf32, #tpu.memory_space<vmem>>, vector<1x32xf32>,
    %c3_i32_89 = arith.constant 3 : i32
    %193 = arith.muli %176, %c3_i32_89 : i32
    %c2_i32_90 = arith.constant 2 : i32
    %194 = arith.addi %193, %c2_i32_90 : i32
    %195 = arith.index_cast %194 : i32 to index
    %196 = memref.load %arg1[%195] : memref<24xi32, #tpu.memory_space<smem>>
    %197 = arith.index_cast %196 : i32 to index
    %c0_91 = arith.constant 0 : index
    %198 = vector.load %arg4[%197, %c0_91] : memref<7x16xf32, #tpu.memory_space<vmem>>, vector<1x16xf32>
    %199 = arith.index_cast %c7_i32 : i32 to index
    %c48_92 = arith.constant 48 : index
    %200 = vector.load %arg5[%199, %c48_92] : memref<8x64xf32, #tpu.memory_space<vmem>>, vector<1x16xf32>
    tpu.vector_store %arg5[%199, %c48_92], %198 {strides = array<i32>} : memref<8x64xf32, #tpu.memory_space<vmem>>, vector<1x16xf32>,
    %c8_i32_93 = arith.constant 8 : i32
    return
  }
  func.func @transform_0(%arg0: i32, %arg1: memref<24xi32, #tpu.memory_space<smem>>) -> (i32, i32) {
    %c0_i32 = arith.constant 0 : i32
    %c0_i32_0 = arith.constant 0 : i32
    %c0_i32_1 = arith.constant 0 : i32
    return %c0_i32, %c0_i32_0 : i32, i32
  }
  func.func @transform_1(%arg0: i32, %arg1: memref<24xi32, #tpu.memory_space<smem>>) -> (i32, i32) {
    %c0_i32 = arith.constant 0 : i32
    %c0_i32_0 = arith.constant 0 : i32
    %c0_i32_1 = arith.constant 0 : i32
    return %c0_i32, %c0_i32_0 : i32, i32
  }
  func.func @transform_2(%arg0: i32, %arg1: memref<24xi32, #tpu.memory_space<smem>>) -> (i32, i32) {
    %c0_i32 = arith.constant 0 : i32
    %c0_i32_0 = arith.constant 0 : i32
    %c0_i32_1 = arith.constant 0 : i32
    return %c0_i32, %c0_i32_0 : i32, i32
  }
  func.func @transform_3(%arg0: i32, %arg1: memref<24xi32, #tpu.memory_space<smem>>) -> (i32, i32) {
    %c0_i32 = arith.constant 0 : i32
    %c0_i32_0 = arith.constant 0 : i32
    return %arg0, %c0_i32 : i32, i32
  }
}

</mosaic_0001>

<bundles_post_ra>
// kernel: tpu_custom_call.1
= control target key start
LH: loop header
LB: loop body
LE: loop exit
PB: predicated region body
PF: predicated region fallthrough
CT: control target
= control target key end

     0   :  { %s454_s18 = smov [#allocation3]   ;;  %s543_s0 = inlined_call_operand.hbm [shape: s32[24], index: 0, kind: input, shape index: {}]   ;;  %s544_s1 = inlined_call_operand.hbm [shape: f32[10,16], index: 1, kind: input, shape index: {}]   ;;  %s545_s2 = inlined_call_operand.hbm [shape: f32[20,32], index: 2, kind: input, shape index: {}]   ;;  %s546_s3 = inlined_call_operand.hbm [shape: f32[7,16], index: 3, kind: input, shape index: {}]   ;;  %s547_s4 = inlined_call_operand.hbm [shape: f32[8,64], index: 4, kind: output, shape index: {}]  }
   0x1   :  { %s10_s17 = sshll.u32 %s543_s0, 4  ;;  %s11_s17 = int_to_ptr.hbm [resolvable:$true] %s10_s17 }
   0x2   :  { %13 = dma.hbm_to_smem %s11_s17, 16, %s454_s18, [#allocation2] }
   0x3   :  { %446 = dma.done.wait [#allocation2], 16 }
   0x4   :  { %447 = vsyncadd [#allocation2], 4294967280 }
   0x5   :  { %16 = sfence }
   0x6   :  { %17 = vsyncpa [#allocation5], 0 }
   0x7   :  { %18 = vsyncpa [#allocation8], 0 }
   0x8   :  { %19 = vsyncpa [#allocation6], 0  ;;  %s37_s21 = sshll.u32 %s545_s2, 4  ;;  %s455_s22 = smov [#allocation7]   ;;  %s38_s21 = int_to_ptr.hbm [resolvable:$true] %s37_s21 }
   0x9   :  { %s39_s23 = sshll.u32 %s455_s22, 4  ;;  %s24_s0 = sshll.u32 %s544_s1, 4  ;;  %s40_s23 = int_to_ptr.vmem [resolvable:$true] %s39_s23  ;;  %s25_s0 = int_to_ptr.hbm [resolvable:$true] %s24_s0 }
   0xa   :  { %s456_s26 = smov 128   ;;  %s457_s27 = smov 8  }
   0xb   :  { %45 = dma.hbm_to_vmem [thread:$0]  %s38_s21, 384, %s40_s23, [#allocation8], %s456_s26, %s456_s26, %s457_s27  }
   0xc   :  { %s458_s28 = smov [#allocation4]   ;;  %s51_s6 = sshll.u32 %s546_s3, 4  ;;  %s52_s6 = int_to_ptr.hbm [resolvable:$true] %s51_s6 }
   0xd   :  { %s26_s29 = sshll.u32 %s458_s28, 4  ;;  %s459_s2 = smov [#allocation9]   ;;  %s27_s29 = int_to_ptr.vmem [resolvable:$true] %s26_s29 }
   0xe   :  { %32 = dma.hbm_to_vmem [thread:$0]  %s25_s0, 256, %s27_s29, [#allocation5], %s456_s26, %s456_s26, %s457_s27  }
   0xf   :  { %s53_s7 = sshll.u32 %s459_s2, 4  ;;  %s54_s7 = int_to_ptr.vmem [resolvable:$true] %s53_s7 }
  0x10   :  { %56 = dma.hbm_to_vmem [thread:$0]  %s52_s6, 128, %s54_s7, [#allocation8]  }
  0x11   :  { %448 = dma.done.wait [#allocation5], 256  }
  0x12   :  { %449 = vsyncadd [#allocation5], 4294967040 }
  0x13   :  { %450 = dma.done.wait [#allocation8], 512  }
  0x14   :  { %451 = vsyncadd [#allocation8], 4294966784  ;;  %s306_s1 = sld [smem:[#allocation3 + $0x1]]  ;;  %s460_s13 = smov 16   ;;  %vm74_vm0 = vcmask 122880   ;;  %vm84_vm1 = vcmask 385152  }
  0x15   :  { %s309_s8 = sld [smem:[#allocation3 + $0x4]]  ;;  %s461_s20 = smov 48   ;;  %vm94_vm2 = vcmask 516480  }
  0x16   :  { %s307_s9 = sld [smem:[#allocation3 + $0x2]] }
  0x17   :  { %s312_s10 = sld [smem:[#allocation3 + $0x7]] }
  0x18   :  { %s315_s12 = sld [smem:[#allocation3 + $0xa]] }
  0x19   :  { %s321_s14 = sld [smem:[#allocation3 + $0x10]] }
  0x1a   :  { %s78_s11 = scalar_lea.vmem [#allocation7], %s306_s1  ;;  %s318_s15 = sld [smem:[#allocation3 + $0xd]] }
  0x1b   :  { %v79_v0 = vld [vmem:[%s78_s11] sm:$0x1]  ;;  %s104_s3 = scalar_lea.vmem [#allocation7], %s309_s8  ;;  %s324_s16 = sld [smem:[#allocation3 + $0x13]] }
  0x1c   :  { %81 = vrot.lane.b32.xlu0 %v79_v0, %s460_s13  ;;  %v105_v1 = vld [vmem:[%s104_s3] sm:$0x1]  ;;  %s88_s17 = scalar_lea.vmem [#allocation9], %s307_s9  ;;  %s327_s21 = sld [smem:[#allocation3 + $0x16]] }
  0x1d   :  { %107 = vrot.lane.b32.xlu1 %v105_v1, %s460_s13  ;;  %v89_v2 = vld [vmem:[%s88_s17] sm:$0x1]  ;;  %s128_s18 = scalar_lea.vmem [#allocation7], %s312_s10  ;;  %s310_s22 = sld [smem:[#allocation3 + $0x5]] }
  0x1e   :  { %v129_v3 = vld [vmem:[%s128_s18] sm:$0x1]  ;;  %s152_s19 = scalar_lea.vmem [#allocation7], %s315_s12  ;;  %s313_s23 = sld [smem:[#allocation3 + $0x8]] }
  0x1f   :  { %v153_v4 = vld [vmem:[%s152_s19] sm:$0x1]  ;;  %s200_s25 = scalar_lea.vmem [#allocation7], %s321_s14  ;;  %s316_s26 = sld [smem:[#allocation3 + $0xb]] }
  0x20   :  { %155 = vrot.lane.b32.xlu2 %v153_v4, %s460_s13  ;;  %s176_s24 = scalar_lea.vmem [#allocation7], %s318_s15  ;;  %v201_v6 = vld [vmem:[%s200_s25] sm:$0x1]  ;;  %s319_s27 = sld [smem:[#allocation3 + $0xe]] }
  0x21   :  { %v177_v5 = vld [vmem:[%s176_s24] sm:$0x1]  ;;  %s224_s0 = scalar_lea.vmem [#allocation7], %s324_s16  ;;  %s322_s28 = sld [smem:[#allocation3 + $0x11]] }
  0x22   :  { %v225_v7 = vld [vmem:[%s224_s0] sm:$0x1]  ;;  %s248_s29 = scalar_lea.vmem [#allocation7], %s327_s21  ;;  %s325_s6 = sld [smem:[#allocation3 + $0x14]] }
  0x23   :  { %v249_v8 = vld [vmem:[%s248_s29] sm:$0x1]  ;;  %s113_s30 = scalar_lea.vmem [#allocation9], %s310_s22  ;;  %s328_s2 = sld [smem:[#allocation3 + $0x17]] }
  0x24   :  { %91 = vrot.lane.b32.xlu0 %v89_v2, %s461_s20  ;;  %v114_v9 = vld [vmem:[%s113_s30] sm:$0x1]  ;;  %s137_s5 = scalar_lea.vmem [#allocation9], %s313_s23  ;;  %s71_s11 = sld [smem:[#allocation3]] }
  0x25   :  { %131 = vrot.lane.b32.xlu1 %v129_v3, %s460_s13  ;;  %v138_v10 = vld [vmem:[%s137_s5] sm:$0x1]  ;;  %s161_s7 = scalar_lea.vmem [#allocation9], %s316_s26  ;;  %s314_s12 = sld [smem:[#allocation3 + $0x9]] }
  0x26   :  { %v162_v11 = vld [vmem:[%s161_s7] sm:$0x1]  ;;  %s185_s1 = scalar_lea.vmem [#allocation9], %s319_s27  ;;  %s317_s3 = sld [smem:[#allocation3 + $0xc]] }
  0x27   :  { %v186_v12 = vld [vmem:[%s185_s1] sm:$0x1]  ;;  %s209_s8 = scalar_lea.vmem [#allocation9], %s322_s28  ;;  %s311_s14 = sld [smem:[#allocation3 + $0x6]] }
  0x28   :  { %179 = vrot.lane.b32.xlu2 %v177_v5, %s460_s13  ;;  %v210_v13 = vld [vmem:[%s209_s8] sm:$0x1]  ;;  %s233_s9 = scalar_lea.vmem [#allocation9], %s325_s6  ;;  %s320_s16 = sld [smem:[#allocation3 + $0xf]] }
  0x29   :  { %v234_v14 = vld [vmem:[%s233_s9] sm:$0x1]  ;;  %s257_s10 = scalar_lea.vmem [#allocation9], %s328_s2  ;;  %s326_s19 = sld [smem:[#allocation3 + $0x15]] }
  0x2a   :  { %v258_v15 = vld [vmem:[%s257_s10] sm:$0x1]  ;;  %s72_s15 = scalar_lea.vmem [#allocation4], %s71_s11  ;;  %s462_s0 = smov [#allocation10]  }
  0x2b   :  { %v73_v16 = vld [vmem:[%s72_s15] sm:$0x1]  ;;  %s147_s17 = scalar_lea.vmem [#allocation4], %s314_s12  ;;  %s269_s26 = sshll.u32 %s462_s0, 4  ;;  %s270_s26 = int_to_ptr.vmem [resolvable:$true] %s269_s26 }
  0x2c   :  { %203 = vrot.lane.b32.xlu0 %v201_v6, %s460_s13  ;;  %75 = vst.msk [vmem:[#allocation10] sm:$0x1] %vm74_vm0, %v73_v16  ;;  %v148_v17 = vld [vmem:[%s147_s17] sm:$0x1]  ;;  %s171_s21 = scalar_lea.vmem [#allocation4], %s317_s3  ;;  %s271_s29 = sshll.u32 %s547_s4, 4  ;;  %s272_s29 = int_to_ptr.hbm [resolvable:$true] %s271_s29 }
  0x2d   :  { %227 = vrot.lane.b32.xlu1 %v225_v7, %s460_s13  ;;  %149 = vst.msk [vmem:[#allocation10 + $0x3] sm:$0x1] %vm74_vm0, %v148_v17  ;;  %v172_v19 = vld [vmem:[%s171_s21] sm:$0x1]  ;;  %s123_s22 = scalar_lea.vmem [#allocation4], %s311_s14 }
  0x2e   :  { %v124_v20 = vld [vmem:[%s123_s22] sm:$0x1]  ;;  %173 = vst.msk [vmem:[#allocation10 + $0x4] sm:$0x1] %vm74_vm0, %v172_v19  ;;  %s195_s23 = scalar_lea.vmem [#allocation4], %s320_s16 }
  0x2f   :  { %v196_v21 = vld [vmem:[%s195_s23] sm:$0x1]  ;;  %125 = vst.msk [vmem:[#allocation10 + $0x2] sm:$0x1] %vm74_vm0, %v124_v20  ;;  %s243_s24 = scalar_lea.vmem [#allocation4], %s326_s19 }
  0x30   :  { %251 = vrot.lane.b32.xlu2 %v249_v8, %s460_s13  ;;  %s308_s13 = sld [smem:[#allocation3 + $0x3]]  ;;  %197 = vst.msk [vmem:[#allocation10 + $0x5] sm:$0x1] %vm74_vm0, %v196_v21  ;;  %v244_v23 = vld [vmem:[%s243_s24] sm:$0x1] }
  0x31   :  { %245 = vst.msk [vmem:[#allocation10 + $0x7] sm:$0x1] %vm74_vm0, %v244_v23 }
  0x34   :  { %116 = vrot.lane.b32.xlu0 %v114_v9, %s461_s20 }
  0x35   :  { %140 = vrot.lane.b32.xlu1 %v138_v10, %s461_s20 }
  0x36   :  { %s99_s18 = scalar_lea.vmem [#allocation4], %s308_s13 }
  0x37   :  { %v100_v18 = vld [vmem:[%s99_s18] sm:$0x1] }
  0x38   :  { %164 = vrot.lane.b32.xlu2 %v162_v11, %s461_s20  ;;  %101 = vst.msk [vmem:[#allocation10 + $0x1] sm:$0x1] %vm74_vm0, %v100_v18 }
  0x3c   :  { %188 = vrot.lane.b32.xlu0 %v186_v12, %s461_s20 }
  0x3d   :  { %212 = vrot.lane.b32.xlu1 %v210_v13, %s461_s20 }
  0x40   :  { %236 = vrot.lane.b32.xlu2 %v234_v14, %s461_s20 }
  0x44   :  { %260 = vrot.lane.b32.xlu0 %v258_v15, %s461_s20  ;;  %s323_s20 = sld [smem:[#allocation3 + $0x12]] }
  0x4a   :  { %s219_s25 = scalar_lea.vmem [#allocation4], %s323_s20 }
  0x4b   :  { %v220_v24 = vld [vmem:[%s219_s25] sm:$0x1] }
  0x4c   :  { %221 = vst.msk [vmem:[#allocation10 + $0x6] sm:$0x1] %vm74_vm0, %v220_v24 }
  0x7a   :  { %v156_v22 = vpop.permute.xlu2 %155 }
  0x7b   :  { %158 = vst.msk [vmem:[#allocation10 + $0x3] sm:$0x1] %vm84_vm1, %v156_v22 }
  0x82   :  { %v180_v25 = vpop.permute.xlu2 %179 }
  0x83   :  { %182 = vst.msk [vmem:[#allocation10 + $0x4] sm:$0x1] %vm84_vm1, %v180_v25 }
  0x8a   :  { %v252_v26 = vpop.permute.xlu2 %251 }
  0x8b   :  { %254 = vst.msk [vmem:[#allocation10 + $0x7] sm:$0x1] %vm84_vm1, %v252_v26 }
  0x8e   :  { %v82_v27 = vpop.permute.xlu0 %81 }
  0x8f   :  { %85 = vst.msk [vmem:[#allocation10] sm:$0x1] %vm84_vm1, %v82_v27  ;;  %v108_v28 = vpop.permute.xlu1 %107 }
  0x90   :  { %110 = vst.msk [vmem:[#allocation10 + $0x1] sm:$0x1] %vm84_vm1, %v108_v28 }
  0x92   :  { %v165_v29 = vpop.permute.xlu2 %164 }
  0x93   :  { %167 = vst.msk [vmem:[#allocation10 + $0x3] sm:$0x1] %vm94_vm2, %v165_v29 }
  0x96   :  { %v92_v30 = vpop.permute.xlu0 %91 }
  0x97   :  { %95 = vst.msk [vmem:[#allocation10] sm:$0x1] %vm94_vm2, %v92_v30  ;;  %v132_v31 = vpop.permute.xlu1 %131 }
  0x98   :  { %134 = vst.msk [vmem:[#allocation10 + $0x2] sm:$0x1] %vm84_vm1, %v132_v31 }
  0x9a   :  { %v237_v33 = vpop.permute.xlu2 %236 }
  0x9e   :  { %v204_v32 = vpop.permute.xlu0 %203 }
  0x9f   :  { %206 = vst.msk [vmem:[#allocation10 + $0x5] sm:$0x1] %vm84_vm1, %v204_v32  ;;  %v228_v34 = vpop.permute.xlu1 %227 }
  0xa0   :  { %230 = vst.msk [vmem:[#allocation10 + $0x6] sm:$0x1] %vm84_vm1, %v228_v34 }
  0xa1   :  { %239 = vst.msk [vmem:[#allocation10 + $0x6] sm:$0x1] %vm94_vm2, %v237_v33 }
  0xa6   :  { %v117_v35 = vpop.permute.xlu0 %116 }
  0xa7   :  { %119 = vst.msk [vmem:[#allocation10 + $0x1] sm:$0x1] %vm94_vm2, %v117_v35  ;;  %v141_v36 = vpop.permute.xlu1 %140 }
  0xa8   :  { %143 = vst.msk [vmem:[#allocation10 + $0x2] sm:$0x1] %vm94_vm2, %v141_v36 }
  0xae   :  { %v189_v37 = vpop.permute.xlu0 %188 }
  0xaf   :  { %191 = vst.msk [vmem:[#allocation10 + $0x4] sm:$0x1] %vm94_vm2, %v189_v37  ;;  %v213_v38 = vpop.permute.xlu1 %212 }
  0xb0   :  { %215 = vst.msk [vmem:[#allocation10 + $0x5] sm:$0x1] %vm94_vm2, %v213_v38 }
  0xb6   :  { %v261_v39 = vpop.permute.xlu0 %260 }
  0xb7   :  { %263 = vst.msk [vmem:[#allocation10 + $0x7] sm:$0x1] %vm94_vm2, %v261_v39 }
  0xb8   :  { %274 = dma.vmem_to_hbm [thread:$0]  %s270_s26, 128, %s272_s29, [#allocation6]  }
  0xb9   :  { %452 = dma.done.wait [#allocation6], 128  }
  0xba   :  { %453 = vsyncadd [#allocation6], 4294967168 }
  0xbb   :  { %279 = vsyncpa [#allocation5], 1 }
  0xbc   :  { %280 = vsyncpa [#allocation8], 1 }
  0xbd   :  { %281 = vsyncpa [#allocation6], 1 }

</bundles_post_ra>
